<compile_context>
chip_gen: v6e
topology: v6e:2x2x1
jax: 0.10.0
libtpu: 0.0.40
codegen_flags: <defaults>
</compile_context>

<pallas_src>
import functools
import math

import jax
import jax.numpy as jnp
import numpy as np
from jax import lax
from jax.experimental import pallas as pl
from jax.experimental.pallas import tpu as pltpu


_TR_MIN = 512        # lane-dense stores in the streamed (two-pass) path


def _round_up(a, b):
    return -(-a // b) * b


def _vmem_plan():
    """Per-generation block budget + scoped-VMEM limit.

    v5e/v6e (128 MiB VMEM): 12 MiB blocks, 72 MiB scoped limit.
    v7x     ( 64 MiB VMEM):  8 MiB blocks, 48 MiB scoped limit.
    """
    vmem_cap = 64 * 1024 * 1024          # conservative fallback (v7x-sized)
    try:
        info = pltpu.get_tpu_info()
        cap = getattr(info, "vmem_capacity_bytes", None)
        if cap:
            vmem_cap = int(cap)
    except Exception:
        pass
    block_budget = int(min(12 * 1024 * 1024, vmem_cap // 8))
    vmem_limit = int(min((vmem_cap * 3) // 4,
                         max(6 * block_budget, 32 * 1024 * 1024)))
    return block_budget, vmem_limit


# ---------------------------------------------------------------------------
# p-norm helpers (specialised so p=1 / p=2 / small integer p stay off the EUP)
# ---------------------------------------------------------------------------
def _reduce_sum(v, axes):
    # One axis at a time (lanes first, then sublane/leading axes) so every
    # reduction is a plain single-axis reduce.
    for a in sorted(axes, reverse=True):
        v = jnp.sum(v, axis=a, keepdims=True)
    return v


def _pnorm_partial(xf, p, axes):
    if p == 2.0:
        return _reduce_sum(xf * xf, axes)
    if p == 1.0:
        return _reduce_sum(jnp.abs(xf), axes)
    if float(p).is_integer() and 0.0 < p <= 8.0:
        base = jnp.abs(xf)
        prod = base
        for _ in range(int(p) - 1):
            prod = prod * base
        return _reduce_sum(prod, axes)
    return _reduce_sum(jnp.power(jnp.abs(xf), p), axes)


def _finish_norm(acc, p):
    if p == 2.0:
        return jnp.sqrt(acc)
    if p == 1.0:
        return acc
    return jnp.power(acc, 1.0 / p)


def _scale_from_norm(norm, p, maxnorm):
    # torch.renorm: scale by maxnorm / (norm + 1e-7) only where norm > maxnorm.
    return jnp.where(norm > maxnorm,
                     maxnorm / (norm + jnp.float32(1e-7)),
                     jnp.float32(1.0))


# ---------------------------------------------------------------------------
# Kernels
# ---------------------------------------------------------------------------
def _renorm_block_kernel(x_ref, o_ref, *, p, maxnorm, keep_axis):
    """Single-pass: full reduction extent resident; per-`keep_axis` norm + scale."""
    x = x_ref[...]
    axes = tuple(a for a in range(x.ndim) if a != keep_axis)
    xf = x if x.dtype == jnp.float32 else x.astype(jnp.float32)
    norm = _finish_norm(_pnorm_partial(xf, p, axes), p)
    scale = _scale_from_norm(norm, p, maxnorm)
    if o_ref.dtype == jnp.float32:
        o_ref[...] = xf * scale
    else:
        # Norm stays f32; scale applied in the input dtype (no f32 block temp).
        o_ref[...] = x * scale.astype(x.dtype)


def _norm_accum_kernel(x_ref, acc_ref, *, p, r_total, tr):
    """Two-pass, pass 1: accumulate per-row sum(|x|^p) across R chunks."""
    rj = pl.program_id(1)

    @pl.when(rj == 0)
    def _():
        acc_ref[...] = jnp.zeros_like(acc_ref)

    xf = x_ref[...].astype(jnp.float32)
    if r_total % tr != 0:
        # Mask the padded tail of the last R chunk (0 contributes nothing).
        col = lax.broadcasted_iota(jnp.int32, xf.shape, 1) + rj * tr
        xf = jnp.where(col < r_total, xf, jnp.float32(0.0))
    acc_ref[...] += _pnorm_partial(xf, p, (1,))


def _apply_scale_kernel(x_ref, acc_ref, o_ref, *, p, maxnorm):
    """Two-pass, pass 2: finish the norm, compute and apply the per-row scale."""
    norm = _finish_norm(acc_ref[...], p)
    scale = _scale_from_norm(norm, p, maxnorm)
    x = x_ref[...]
    if o_ref.dtype == jnp.float32:
        o_ref[...] = x * scale
    else:
        o_ref[...] = x * scale.astype(x.dtype)


# ---------------------------------------------------------------------------
# pallas_call wrappers
# ---------------------------------------------------------------------------
def _choose_td(d, gran, max_rows):
    """Rows (along the kept axis) per block: as large as the VMEM budget allows,
    while targeting >= 4 (even) grid steps so v7x's two TensorCores each get
    >= 2 blocks and intra-core double-buffering stays active."""
    if d <= gran:
        return d
    max_rows = max(gran, (max_rows // gran) * gran)
    min_steps = pl.cdiv(d, max_rows)
    target = max(min_steps, 4 if d >= 4 * gran else 2)
    target = _round_up(target, 2)
    td = min(max_rows, _round_up(pl.cdiv(d, target), gran))
    return max(gran, td)


def _renorm_single_pass(xv, p, maxnorm, *, keep_axis, gran, budget, vmem_limit):
    """One pallas_call; each block holds the FULL reduction extent and a tile
    of the kept (renorm) axis. 2 HBM passes total."""
    shape = tuple(int(s) for s in xv.shape)
    rank = len(shape)
    d = shape[keep_axis]
    itemsize = int(jnp.dtype(xv.dtype).itemsize)
    other = 1
    for a, s in enumerate(shape):
        if a != keep_axis:
            other *= s
    row_bytes = max(1, other * itemsize)
    max_rows = max(min(d, gran), (budget // row_bytes) // gran * gran)
    td = _choose_td(d, gran, max_rows)
    steps = pl.cdiv(d, td)

    block_shape = tuple(td if a == keep_axis else shape[a] for a in range(rank))
    idx_map = lambda i: tuple(i if a == keep_axis else 0 for a in range(rank))

    n = d * other
    cost = pl.CostEstimate(flops=3 * n, transcendentals=d,
                           bytes_accessed=2 * n * itemsize)
    return pl.pallas_call(
        functools.partial(_renorm_block_kernel, p=p, maxnorm=maxnorm,
                          keep_axis=keep_axis),
        out_shape=jax.ShapeDtypeStruct(shape, xv.dtype),
        grid=(steps,),
        in_specs=[pl.BlockSpec(block_shape, idx_map)],
        out_specs=pl.BlockSpec(block_shape, idx_map),
        compiler_params=pltpu.CompilerParams(
            dimension_semantics=("parallel",),
            vmem_limit_bytes=vmem_limit),
        cost_estimate=cost,
    )(xv)


def _renorm_two_pass(x2d, p, maxnorm, *, budget, vmem_limit):
    """Fallback when even a minimal single-pass block exceeds the budget.
    Layout: (D, R) with D on sublanes; reduction (R) axis last in the grid."""
    d, r = (int(s) for s in x2d.shape)
    itemsize = int(jnp.dtype(x2d.dtype).itemsize)
    tdb = d if d <= 256 else 256
    tr_cap = max(128, (budget // max(1, tdb * itemsize)) // 128 * 128)
    tr = min(tr_cap, max(_TR_MIN, _round_up(pl.cdiv(r, 2), 128)))
    if tr >= r:
        tr = r
    nd, nr = pl.cdiv(d, tdb), pl.cdiv(r, tr)
    n = d * r

    # Pass 1: per-row sum(|x|^p), accumulated across R chunks.
    norm_acc = pl.pallas_call(
        functools.partial(_norm_accum_kernel, p=p, r_total=r, tr=tr),
        out_shape=jax.ShapeDtypeStruct((d, 1), jnp.float32),
        grid=(nd, nr),
        in_specs=[pl.BlockSpec((tdb, tr), lambda i, j: (i, j))],
        out_specs=pl.BlockSpec((tdb, 1), lambda i, j: (i, 0)),
        compiler_params=pltpu.CompilerParams(
            dimension_semantics=("parallel", "arbitrary"),
            vmem_limit_bytes=vmem_limit),
        cost_estimate=pl.CostEstimate(flops=2 * n, transcendentals=0,
                                      bytes_accessed=n * itemsize + 4 * d),
    )(x2d)

    # Pass 2: finish norm -> scale -> apply; fully parallel grid.
    return pl.pallas_call(
        functools.partial(_apply_scale_kernel, p=p, maxnorm=maxnorm),
        out_shape=jax.ShapeDtypeStruct((d, r), x2d.dtype),
        grid=(nd, nr),
        in_specs=[pl.BlockSpec((tdb, tr), lambda i, j: (i, j)),
                  pl.BlockSpec((tdb, 1), lambda i, j: (i, 0))],
        out_specs=pl.BlockSpec((tdb, tr), lambda i, j: (i, j)),
        compiler_params=pltpu.CompilerParams(
            dimension_semantics=("parallel", "parallel"),
            vmem_limit_bytes=vmem_limit),
        cost_estimate=pl.CostEstimate(flops=n, transcendentals=d * nr,
                                      bytes_accessed=2 * n * itemsize + 4 * d),
    )(x2d, norm_acc)


# ---------------------------------------------------------------------------
# Public wrapper
# ---------------------------------------------------------------------------
def renorm_pallas(x, p, dim, maxnorm):
    """JAX/Pallas equivalent of torch.renorm(x, p, dim, maxnorm)."""
    p = float(p)
    maxnorm = float(maxnorm)
    dim = dim % x.ndim
    shape = tuple(int(s) for s in x.shape)

    pre = int(np.prod(shape[:dim], dtype=np.int64)) if dim > 0 else 1
    d = shape[dim]
    post = int(np.prod(shape[dim + 1:], dtype=np.int64)) if dim + 1 < x.ndim else 1

    itemsize = int(jnp.dtype(x.dtype).itemsize)
    sub = 8 if itemsize >= 4 else (16 if itemsize == 2 else 32)
    budget, vmem_limit = _vmem_plan()

    if pre == 1:
        # renorm dim leads: view (D, R) with D on sublanes (free reshape).
        r = post
        x2d = x.reshape(d, r)
        row_bytes = max(1, r * itemsize)
        if row_bytes * min(d, sub) <= budget:
            if d < sub:
                # Tiny D: repack each logical row into `sub` sublanes so every
                # 2-D tile is sublane-dense: (D, R) -> (D, sub, R/sub), free.
                s = sub
                if r % s == 0 and (r // s) >= 128:
                    out = _renorm_single_pass(
                        x2d.reshape(d, s, r // s), p, maxnorm, keep_axis=0,
                        gran=sub, budget=budget, vmem_limit=vmem_limit)
                    return out.reshape(shape)
            out2d = _renorm_single_pass(x2d, p, maxnorm, keep_axis=0, gran=sub,
                                        budget=budget, vmem_limit=vmem_limit)
        else:
            out2d = _renorm_two_pass(x2d, p, maxnorm,
                                     budget=budget, vmem_limit=vmem_limit)
        return out2d.reshape(shape)

    if post == 1:
        # renorm dim trails: view (R, D) with D on lanes (free reshape).
        x2d = x.reshape(pre, d)
        col_bytes = max(1, pre * itemsize)
        if col_bytes * min(d, 128) <= budget:
            out2d = _renorm_single_pass(x2d, p, maxnorm, keep_axis=1, gran=128,
                                        budget=budget, vmem_limit=vmem_limit)
            return out2d.reshape(shape)
        # TODO(synk): native lane-major two-pass (accumulate over `pre` chunks)
        # to also avoid this transpose for very large trailing-dim tensors.
        xm = jnp.moveaxis(x, dim, 0)
        out2d = _renorm_two_pass(xm.reshape(d, pre), p, maxnorm,
                                 budget=budget, vmem_limit=vmem_limit)
        return jnp.moveaxis(out2d.reshape(xm.shape), 0, dim)

    # Interior dim: view (pre, D, post) (free reshape), reduce pre/post in-kernel.
    x3 = x.reshape(pre, d, post)
    slab_bytes = max(1, pre * post * itemsize)
    if slab_bytes * min(d, sub) <= budget:
        out3 = _renorm_single_pass(x3, p, maxnorm, keep_axis=1, gran=sub,
                                   budget=budget, vmem_limit=vmem_limit)
        return out3.reshape(shape)
    # TODO(synk): native (pre, D, post) two-pass (grid over pre/post chunks with
    # a (D, 1) accumulator) to avoid this transpose for huge interior-dim tensors.
    xm = jnp.moveaxis(x, dim, 0)
    out2d = _renorm_two_pass(xm.reshape(d, pre * post), p, maxnorm,
                             budget=budget, vmem_limit=vmem_limit)
    return jnp.moveaxis(out2d.reshape(xm.shape), 0, dim)


def _renorm_ref(x, p, dim, maxnorm):
    """Pure-JAX reference for correctness checking."""
    dim = dim % x.ndim
    xm = jnp.moveaxis(x, dim, 0).astype(jnp.float32)
    flat = xm.reshape(xm.shape[0], -1)
    norm = jnp.power(jnp.sum(jnp.power(jnp.abs(flat), p), axis=1), 1.0 / p)
    scale = jnp.where(norm > maxnorm, maxnorm / (norm + 1e-7), 1.0)
    out = flat * scale[:, None]
    return jnp.moveaxis(out.reshape(xm.shape), 0, dim).astype(x.dtype)


if __name__ == "__main__":
    # Module hyper-parameters (renorm has no learned weights).
    p, dim, maxnorm = 2.0, 0, 1.0

    k0, k1, k2 = jax.random.split(jax.random.PRNGKey(0), 3)

    def _check(y, x, d, rtol=1e-5, atol=1e-5):
        ref = _renorm_ref(x, p, d, maxnorm)
        np.testing.assert_allclose(np.asarray(y.astype(jnp.float32)),
                                   np.asarray(ref.astype(jnp.float32)),
                                   rtol=rtol, atol=atol)

    # 1) Module's input; dim=0 -> D=2, R=1024: single-pass, sublane-repacked tiny-D path.
    x = jax.random.normal(k0, (2, 4, 16, 16), dtype=jnp.float32) * 3.0
    y = jax.block_until_ready(renorm_pallas(x, p, dim, maxnorm))
    _check(y, x, dim)

    # 2) Larger D -> single-pass D-tiled "parallel" grid (4 even steps).
    x2 = jax.random.normal(k1, (32, 4, 16, 16), dtype=jnp.float32) * 3.0
    y2 = jax.block_until_ready(renorm_pallas(x2, p, 0, maxnorm))
    _check(y2, x2, 0)

    # 3) Interior dim (dim=1) -> transpose-free (pre, D, post) path.
    y3 = jax.block_until_ready(renorm_pallas(x, p, 1, maxnorm))
    _check(y3, x, 1)

    # 4) Trailing dim (dim=3) -> transpose-free lane-major path.
    y4 = jax.block_until_ready(renorm_pallas(x, p, 3, maxnorm))
    _check(y4, x, 3)

    # 5) bf16 input: norm accumulated in f32, scale applied in bf16.
    xb = (jax.random.normal(k2, (32, 4, 16, 16), dtype=jnp.float32) * 3.0
          ).astype(jnp.bfloat16)
    yb = jax.block_until_ready(renorm_pallas(xb, p, 0, maxnorm))
    _check(yb, xb, 0, rtol=3e-2, atol=1e-3)

    print("KERNEL_OK")
</pallas_src>

<mosaic_0001>
module attributes {stable_mosaic.version = 11 : i64} {
  func.func @_renorm_block_kernel(%arg0: i32, %arg1: memref<2x8x128xf32, #tpu.memory_space<vmem>>, %arg2: memref<2x8x128xf32, #tpu.memory_space<vmem>>) attributes {dimension_semantics = [#tpu.dimension_semantics<parallel>], iteration_bounds = array<i64: 1>, scalar_prefetch = 0 : i64, scratch_operands = 0 : i64, tpu.core_type = #tpu.core_type<tc>, window_params = [{transform_indices = @transform_0, window_bounds = array<i64: 2, 8, 128>}, {transform_indices = @transform_1, window_bounds = array<i64: 2, 8, 128>}]} {
    %c0 = arith.constant 0 : index
    %c0_0 = arith.constant 0 : index
    %c0_1 = arith.constant 0 : index
    %0 = vector.load %arg1[%c0, %c0_0, %c0_1] : memref<2x8x128xf32, #tpu.memory_space<vmem>>, vector<2x8x128xf32>
    %1 = arith.mulf %0, %0 : vector<2x8x128xf32>
    %cst = arith.constant dense<0.000000e+00> : vector<2x8xf32>
    %2 = vector.multi_reduction <add>, %1, %cst [2] : vector<2x8x128xf32> to vector<2x8xf32>
    %3 = vector.shape_cast %2 : vector<2x8xf32> to vector<2x8x1xf32>
    %cst_2 = arith.constant dense<0.000000e+00> : vector<2x1xf32>
    %4 = vector.multi_reduction <add>, %3, %cst_2 [1] : vector<2x8x1xf32> to vector<2x1xf32>
    %5 = vector.shape_cast %4 : vector<2x1xf32> to vector<2x1x1xf32>
    %6 = math.sqrt %5 : vector<2x1x1xf32>
    %cst_3 = arith.constant 1.000000e+00 : f32
    %7 = vector.broadcast %cst_3 : f32 to vector<2x1x1xf32>
    %8 = arith.cmpf ogt, %6, %7 : vector<2x1x1xf32>
    %cst_4 = arith.constant 1.000000e-07 : f32
    %9 = vector.broadcast %cst_4 : f32 to vector<2x1x1xf32>
    %10 = arith.addf %6, %9 : vector<2x1x1xf32>
    %cst_5 = arith.constant 1.000000e+00 : f32
    %11 = vector.broadcast %cst_5 : f32 to vector<2x1x1xf32>
    %12 = arith.divf %11, %10 : vector<2x1x1xf32>
    %cst_6 = arith.constant 1.000000e+00 : f32
    %13 = vector.broadcast %cst_6 : f32 to vector<2x1x1xf32>
    %14 = arith.select %8, %12, %13 : vector<2x1x1xi1>, vector<2x1x1xf32>
    %15 = vector.broadcast %14 : vector<2x1x1xf32> to vector<2x8x128xf32>
    %16 = arith.mulf %0, %15 : vector<2x8x128xf32>
    %c0_7 = arith.constant 0 : index
    %c0_8 = arith.constant 0 : index
    %c0_9 = arith.constant 0 : index
    %17 = vector.load %arg2[%c0_7, %c0_8, %c0_9] : memref<2x8x128xf32, #tpu.memory_space<vmem>>, vector<2x8x128xf32>
    tpu.vector_store %arg2[%c0_7, %c0_8, %c0_9], %16 {strides = array<i32>} : memref<2x8x128xf32, #tpu.memory_space<vmem>>, vector<2x8x128xf32>,
    return
  }
  func.func @transform_0(%arg0: i32) -> (i32, i32, i32) {
    %c0_i32 = arith.constant 0 : i32
    %c0_i32_0 = arith.constant 0 : i32
    %c0_i32_1 = arith.constant 0 : i32
    return %arg0, %c0_i32, %c0_i32_0 : i32, i32, i32
  }
  func.func @transform_1(%arg0: i32) -> (i32, i32, i32) {
    %c0_i32 = arith.constant 0 : i32
    %c0_i32_0 = arith.constant 0 : i32
    %c0_i32_1 = arith.constant 0 : i32
    return %arg0, %c0_i32, %c0_i32_0 : i32, i32, i32
  }
}

</mosaic_0001>

<bundles_post_ra>
// kernel: tpu_custom_call.1
= control target key start
LH: loop header
LB: loop body
LE: loop exit
PB: predicated region body
PF: predicated region fallthrough
CT: control target
= control target key end

     0   :  { %6 = vsyncpa [#allocation3], 0  ;;  %s170_s0 = inlined_call_operand.hbm [shape: f32[2,8,128], index: 0, kind: input, shape index: {}]   ;;  %s171_s1 = inlined_call_operand.hbm [shape: f32[2,8,128], index: 1, kind: output, shape index: {}]  }
   0x1   :  { %7 = vsyncpa [#allocation4], 0  ;;  %s144_s6 = smov [#allocation2]  }
   0x2   :  { %s13_s7 = sshll.u32 %s144_s6, 4  ;;  %s14_s7 = int_to_ptr.vmem [resolvable:$true] %s13_s7 }
   0x3   :  { %s108_s8 = scalar_lea.vmem %s14_s7, 256  ;;  %p113_p1 = scmp.lt.s32.totalorder %s14_s7, %s14_s7 }
   0x4   :  { %p109_p0 = scmp.ne.s32.totalorder %s14_s7, %s108_s8  ;;  %p114_p2 = scmp.lt.s32.totalorder %s108_s8, %s108_s8 }
   0x6   :  { %p115_p3 = por %p114_p2, %p113_p1 }
   0x8   :  { %p116_p4 = pnand %p115_p3, %p109_p0 }
   0xa   :  { %119 = shalt.err (!%p116_p4)
}
   0xb   :  { %s145_s9 = smov 128   ;;  %s146_s10 = smov 8  }
   0xc   :  { %19 = dma.hbm_to_vmem [thread:$0]  %s170_s0, 256, %s14_s7, [#allocation3], %s145_s9, %s145_s9, %s146_s10  }
   0xd   :  { %140 = dma.done.wait [#allocation3], 256  }
   0xe   :  { %141 = vsyncadd [#allocation3], 4294967040  ;;  %v23_v0 = vld [vmem:[#allocation2] sm:$0xff]  ;;  %v24_v1 = vld [vmem:[#allocation2 + $0x8] sm:$0xff]  ;;  %s147_s0 = smov [#allocation5]  }
   0xf   :  { %v25_v2 = vmul.f32 %v23_v0, %v23_v0  ;;  %v26_v3 = vmul.f32 %v24_v1, %v24_v1  ;;  %s76_s13 = sshll.u32 %s147_s0, 4  ;;  %s77_s13 = int_to_ptr.vmem [resolvable:$true] %s76_s13 }
  0x10   :  { %s120_s14 = scalar_lea.vmem %s77_s13, 256  ;;  %p125_p6 = scmp.lt.s32.totalorder %s77_s13, %s77_s13 }
  0x11   :  { %27 = vadd.xlane.f32.xlu0 %v25_v2  ;;  %p121_p5 = scmp.ne.s32.totalorder %s77_s13, %s120_s14  ;;  %p126_p7 = scmp.lt.s32.totalorder %s120_s14, %s120_s14 }
  0x13   :  { %p127_p8 = por %p126_p7, %p125_p6 }
  0x15   :  { %29 = vadd.xlane.f32.xlu0 %v26_v3  ;;  %p128_p9 = pnand %p127_p8, %p121_p5 }
  0x9a   :  { %v28_v4 = vpop.xlane.xlu0 %27 }
  0x9b   :  { %v31_v5 = vrot.slane %v28_v4, 4 }
  0x9d   :  { %v32_v6 = vadd.f32 %v31_v5, %v28_v4 }
  0x9e   :  { %v30_v7 = vpop.xlane.xlu0 %29 }
  0x9f   :  { %v33_v8 = vrot.slane %v32_v6, 2  ;;  %v37_v9 = vrot.slane %v30_v7, 4 }
  0xa1   :  { %v34_v10 = vadd.f32 %v33_v8, %v32_v6  ;;  %v38_v11 = vadd.f32 %v37_v9, %v30_v7 }
  0xa3   :  { %v35_v12 = vrot.slane %v34_v10, 1  ;;  %v39_v13 = vrot.slane %v38_v11, 2 }
  0xa5   :  { %v36_v14 = vadd.f32 %v35_v12, %v34_v10  ;;  %v40_v15 = vadd.f32 %v39_v13, %v38_v11 }
  0xa7   :  { %92 = vrsqrt.f32 %v36_v14  ;;  %v41_v16 = vrot.slane %v40_v15, 1  ;;  %vm45_vm0 = vcmp.eq.f32.partialorder %v36_v14, inf  ;;  %v48_v20 = vand.u32 2147483648, %v36_v14 }
  0xa8   :  { %vm47_vm1 = vcmp.eq.f32.partialorder %v36_v14, 0.0 }
  0xa9   :  { %v42_v17 = vadd.f32 %v41_v16, %v40_v15 }
  0xab   :  { %94 = vrsqrt.f32 %v42_v17  ;;  %vm52_vm2 = vcmp.eq.f32.partialorder %v42_v17, inf  ;;  %v55_v26 = vand.u32 2147483648, %v42_v17  ;;  %vm54_vm3 = vcmp.eq.f32.partialorder %v42_v17, 0.0 }
  0xb4   :  { %v93_v18 = vpop.eup %92 }
  0xb5   :  { %v44_v19 = vmul.f32 %v93_v18, %v36_v14 }
  0xb7   :  { %v46_v21 = vsel %vm45_vm0, %v36_v14, %v44_v19 }
  0xb8   :  { %v95_v22 = vpop.eup %94  ;;  %v49_v23 = vsel %vm47_vm1, %v48_v20, %v46_v21 }
  0xb9   :  { %v51_v24 = vmul.f32 %v95_v22, %v42_v17  ;;  %v59_v25 = vadd.f32 1e-07, %v49_v23  ;;  %vm57_vm4 = vcmp.gt.f32.partialorder %v49_v23, 1.0 }
  0xbb   :  { %v53_v27 = vsel %vm52_vm2, %v42_v17, %v51_v24  ;;  %96 = vrcp.f32 %v59_v25 }
  0xbc   :  { %v56_v28 = vsel %vm54_vm3, %v55_v26, %v53_v27 }
  0xbd   :  { %v60_v29 = vadd.f32 1e-07, %v56_v28  ;;  %vm58_vm5 = vcmp.gt.f32.partialorder %v56_v28, 1.0 }
  0xbf   :  { %98 = vrcp.f32 %v60_v29 }
  0xc8   :  { %v97_v30 = vpop.eup %96 }
  0xc9   :  { %v65_v31 = vsel %vm57_vm4, %v97_v30, 1.0 }
  0xca   :  { %v67_v32 = vmul.f32 %v65_v31, %v23_v0 }
  0xcc   :  { %v99_v33 = vpop.eup %98  ;;  %69 = vst [vmem:[#allocation5] sm:$0xff] %v67_v32 }
  0xcd   :  { %v66_v34 = vsel %vm58_vm5, %v99_v33, 1.0 }
  0xce   :  { %v68_v35 = vmul.f32 %v66_v34, %v24_v1 }
  0xd0   :  { %70 = vst [vmem:[#allocation5 + $0x8] sm:$0xff] %v68_v35 }
  0xd1   :  { %131 = shalt.err (!%p128_p9)
}
  0xd2   :  { %82 = dma.vmem_to_hbm [thread:$0]  %s77_s13, 256, %s171_s1, [#allocation4], %s145_s9, %s145_s9, %s146_s10  }
  0xd3   :  { %142 = dma.done.wait [#allocation4], 256  }
  0xd4   :  { %143 = vsyncadd [#allocation4], 4294967040 }
  0xd5   :  { %86 = vsyncpa [#allocation3], 1 }
  0xd6   :  { %87 = vsyncpa [#allocation4], 1 }

</bundles_post_ra>
